<compile_context>
chip_gen: v5e
topology: v5e:2x2
jax: 0.10.0
libtpu: 0.0.40
codegen_flags: <defaults>
</compile_context>

<pallas_src>
import math
import functools

import jax
import jax.numpy as jnp
import numpy as np
from jax import lax
from jax.experimental import pallas as pl
from jax.experimental.pallas import tpu as pltpu


def _round_up(x, m):
    return ((x + m - 1) // m) * m


# --------------- Kernel 1: grouped (per-node-type) fused K|V|Q projection -----------------------
def _proj_kernel(gid_ref, h_ref, w_ref, kv_ref, q_ref, *, out_p):
    # One dense matmul per node block; the [in_p, 3*out_p] weight slab for this block's node type
    # was selected in the index_map via the scalar-prefetched group-id array.
    del gid_ref
    r = jnp.dot(h_ref[...], w_ref[...], preferred_element_type=jnp.float32)
    kv_ref[...] = r[:, :2 * out_p].astype(kv_ref.dtype)      # K | V slab (single edge gather)
    q_ref[...] = r[:, 2 * out_p:3 * out_p].astype(q_ref.dtype)


# -------- Kernel 2: fused edge messages + online segment softmax + node update ------------------
def _agg_kernel(wblk_ref, wchunk_ref, wfirst_ref, wlast_ref, wgrp_ref,
                kv_ref, et_ref, dst_ref, q_ref, aw_ref, bda_ref, bdm_ref,
                out_ref, m_sc, l_sc, acc_sc,
                *, num_heads, d_k, num_rels, block_n, out_p, w_shard):
    del wchunk_ref, wgrp_ref                 # consumed by the index_maps only
    f32 = jnp.float32
    idx = pl.program_id(0) * w_shard + pl.program_id(1)

    @pl.when(wfirst_ref[idx] == 1)           # first edge chunk of this destination-node block
    def _init():
        m_sc[...] = jnp.full_like(m_sc, -1e30)
        l_sc[...] = jnp.zeros_like(l_sc)
        acc_sc[...] = jnp.zeros_like(acc_sc)

    cd = kv_ref.dtype
    ks = kv_ref[:, 0:out_p]                  # [be, out_p]  K[src] of this dst-sorted edge chunk
    vs = kv_ref[:, out_p:2 * out_p]          # [be, out_p]  V[src]
    be = ks.shape[0]

    # One wide MXU pass over all relations, then a per-edge relation select (int etype column).
    kp_w = jnp.dot(ks, bda_ref[...], preferred_element_type=f32)     # [be, R*out_p]
    vp_w = jnp.dot(vs, bdm_ref[...], preferred_element_type=f32)
    et = et_ref[...]                                                  # [be, 1] int32
    kp = jnp.zeros((be, out_p), f32)
    vp = jnp.zeros((be, out_p), f32)
    for r in range(num_rels):
        mr = (et == r).astype(f32)                                    # [be, 1]
        kp = kp + mr * kp_w[:, r * out_p:(r + 1) * out_p]
        vp = vp + mr * vp_w[:, r * out_p:(r + 1) * out_p]
    kp_cd = kp.astype(cd)
    vp_cd = vp.astype(cd)

    # Membership mask: which edge of the chunk belongs to which node row of this block.
    base = wblk_ref[idx] * block_n
    node_ids = base + lax.broadcasted_iota(jnp.int32, (block_n, 1), 0)    # [bn, 1]
    member = node_ids == dst_ref[...]                                     # [bn, be]
    member_f = member.astype(f32)

    # Per-head lane masks, hoisted: built once per chunk, reused by all heads and finalize.
    col = lax.broadcasted_iota(jnp.int32, (1, out_p), 1)
    hms = [jnp.logical_and(col >= h * d_k, col < (h + 1) * d_k).astype(f32)
           for h in range(num_heads)]
    hms_cd = [m.astype(cd) for m in hms]

    q = q_ref[...]                                                        # [bn, out_p] cd
    m_all = m_sc[...]                                                     # lane-expanded state
    l_all = l_sc[...]
    m_upd = jnp.zeros((block_n, out_p), f32)
    l_upd = jnp.zeros((block_n, out_p), f32)
    corr_full = jnp.zeros((block_n, out_p), f32)
    contrib = jnp.zeros((block_n, out_p), f32)
    for h in range(num_heads):
        # head-h scores of every chunk edge vs every node row (pri/sqrt already folded into kp)
        s = lax.dot_general(q * hms_cd[h], kp_cd, (((1,), (1,)), ((), ())),
                            preferred_element_type=f32)                   # [bn, be]
        logits = jnp.where(member, s, -1e30)
        cmax = jnp.max(logits, axis=1, keepdims=True)                     # [bn, 1]
        m_old = m_all[:, h * d_k:h * d_k + 1]
        m_new = jnp.maximum(m_old, cmax)
        corr = jnp.exp(m_old - m_new)                                     # [bn, 1]
        # member_f keeps rows with no member edges in this chunk from polluting l (exp(0)=1).
        p = jnp.exp(logits - m_new) * member_f                            # [bn, be]
        l_new = corr * l_all[:, h * d_k:h * d_k + 1] + jnp.sum(p, axis=1, keepdims=True)
        m_upd = m_upd + m_new * hms[h]
        l_upd = l_upd + l_new * hms[h]
        corr_full = corr_full + corr * hms[h]
        contrib = contrib + hms[h] * jnp.dot(p.astype(cd), vp_cd,
                                             preferred_element_type=f32)  # [bn, out_p]
    m_sc[...] = m_upd                       # full-width stores, no masked 1-lane RMW
    l_sc[...] = l_upd
    acc_sc[...] = acc_sc[...] * corr_full + contrib

    @pl.when(wlast_ref[idx] == 1)           # last edge chunk of this node block -> finalize
    def _finalize():
        t = acc_sc[...] * (1.0 / jnp.maximum(l_sc[...], 1e-30))           # [bn, out_p]
        # a_weight already carries sigmoid(skip) folded into its columns.
        trans = jnp.dot(t.astype(aw_ref.dtype), aw_ref[...], preferred_element_type=jnp.float32)
        out_ref[...] = trans.astype(out_ref.dtype)


# ------------------------------------------ Wrapper ---------------------------------------------
def multihead_hgt_forward(h, ntype, src, dst, etype, params, *, num_heads,
                          block_n=128, block_e=256, compute_dtype=jnp.bfloat16):
    kw, qw, vw, aw, pri, ratt, rmsg, skip = params
    N, in_dim = h.shape
    T, _, out_dim = kw.shape
    R = pri.shape[0]
    E = src.shape[0]
    H = num_heads
    d_k = out_dim // H
    sqrt_dk = math.sqrt(out_dim)             # reference scales by sqrt(out_feat_dim)
    f32 = jnp.float32
    cd = compute_dtype
    LANE = 128

    # --------------- host-side graph preprocessing (CSR-style, like DGL's graph build) ----------
    ntype_np = np.asarray(ntype, np.int64)
    src_np = np.asarray(src, np.int64)
    dst_np = np.asarray(dst, np.int64)
    etype_np = np.asarray(etype, np.int64)

    in_p = _round_up(max(in_dim, 1), LANE)
    out_p = _round_up(max(out_dim, 1), LANE)
    block_n = _round_up(min(block_n, _round_up(N, 8)), 8)
    if block_e >= E:
        block_e = _round_up(E, 8)            # single chunk; full-extent lane block is allowed
    else:
        block_e = _round_up(block_e, LANE)   # multi-chunk path needs lane-aligned chunks

    # Group nodes by type; each group padded to a multiple of block_n.
    gather_parts, gid_list = [], []
    for t in range(T):
        idx_t = np.nonzero(ntype_np == t)[0]
        c = idx_t.shape[0]
        if c == 0:
            continue
        nb = -(-c // block_n)
        pad = nb * block_n - c
        gather_parts.append(np.concatenate([idx_t, np.full((pad,), N, np.int64)]))
        gid_list += [t] * nb
    gather_idx = np.concatenate(gather_parts)            # grouped row -> original node id (N=pad)
    Ng_pad = gather_idx.shape[0]
    B = Ng_pad // block_n
    gid = np.asarray(gid_list, np.int32)                 # [B] node type of each block

    pos = np.zeros((N + 1,), np.int64)                   # original node id -> grouped row
    real = gather_idx < N
    pos[gather_idx[real]] = np.nonzero(real)[0]

    # Sort edges by grouped destination (stable) -> contiguous per-destination segments.
    dst_g = pos[dst_np]
    src_g = pos[src_np]
    eorder = np.argsort(dst_g, kind="stable")
    dst_s = dst_g[eorder]
    src_s = src_g[eorder]
    et_s = etype_np[eorder]
    E_pad = _round_up(E, block_e)
    padE = E_pad - E
    dst_s = np.concatenate([dst_s, np.full((padE,), -1, np.int64)])   # -1 never matches a node
    src_s = np.concatenate([src_s, np.zeros((padE,), np.int64)])
    et_s = np.concatenate([et_s, np.zeros((padE,), np.int64)])

    # Work list: one grid step per (node block, edge chunk) pair holding the block's edges.
    starts = np.searchsorted(dst_s[:E], np.arange(B) * block_n, side="left")
    ends = np.searchsorted(dst_s[:E], (np.arange(B) + 1) * block_n, side="left")
    items, block_item_start = [], []
    for b in range(B):
        block_item_start.append(len(items))
        lo, hi = int(starts[b]), int(ends[b])
        if hi > lo:
            chunks = list(range(lo // block_e, (hi - 1) // block_e + 1))
        else:
            chunks = [0]     # block with no in-edges: dummy item, membership mask kills it
        for k, c in enumerate(chunks):
            items.append((b, c, 1 if k == 0 else 0, 1 if k == len(chunks) - 1 else 0, int(gid[b])))
    W = len(items)

    # Split the work list at a node-block boundary into NSHARD shards (v7x megacore; a size-1 or
    # size-2 'parallel' leading grid axis).  Dummy items replicate the shard's last real item with
    # first=last=0: they only touch scratch (re-initialized on every block's first chunk) and
    # never write the output, so they are correctness-neutral.
    NSHARD = 2 if B >= 2 else 1
    if NSHARD == 2:
        cut = min(block_item_start[1:], key=lambda x: abs(x - W / 2))
        shard_items = [items[:cut], items[cut:]]
    else:
        shard_items = [items]
    w_shard = max(len(s) for s in shard_items)
    flat = []
    for si in shard_items:
        si = list(si)
        b_last, c_last, _, _, g_last = si[-1]
        while len(si) < w_shard:
            si.append((b_last, c_last, 0, 0, g_last))
        flat.extend(si)
    wblk_d = jnp.asarray(np.asarray([it[0] for it in flat], np.int32))
    wchunk_d = jnp.asarray(np.asarray([it[1] for it in flat], np.int32))
    wfirst_d = jnp.asarray(np.asarray([it[2] for it in flat], np.int32))
    wlast_d = jnp.asarray(np.asarray([it[3] for it in flat], np.int32))
    wgrp_d = jnp.asarray(np.asarray([it[4] for it in flat], np.int32))
    gid_d = jnp.asarray(gid)

    # ---------------------- padded / derived tensors (device, XLA) ------------------------------
    pad3 = lambda x, r, c: jnp.pad(x, ((0, 0), (0, r - x.shape[1]), (0, c - x.shape[2])))

    h_pad = jnp.pad(h.astype(cd), ((0, 1), (0, in_p - in_dim)))       # extra zero row = pad node
    h_g = h_pad[jnp.asarray(gather_idx, jnp.int32)]                   # [Ng_pad, in_p]

    # Fused K|V|Q weight slab  [T, in_p, 3*out_p]  (single weight stream, single MXU pass).
    w_kvq = jnp.concatenate([pad3(kw, in_p, out_p), pad3(vw, in_p, out_p),
                             pad3(qw, in_p, out_p)], axis=2).astype(cd)

    # a_weight with sigmoid(skip) folded into its columns (per-head gate == column scaling).
    alpha_cols = jnp.repeat(jax.nn.sigmoid(skip.astype(f32)), d_k, axis=1)   # [T, out_dim]
    aw_p = pad3(aw * alpha_cols[:, None, :], out_p, out_p).astype(cd)

    # Per-relation block-diagonal matrices (relation_pri/sqrt folded into the attention one),
    # concatenated along the relation axis -> one wide MXU pass per chunk in the agg kernel.
    eyeH = jnp.eye(H, dtype=f32)
    ratt_s = ratt * (pri / sqrt_dk)[:, :, None, None]
    bd_att = pad3(jnp.einsum('hg,rhab->rhagb', eyeH, ratt_s).reshape(R, out_dim, out_dim),
                  out_p, out_p)
    bd_msg = pad3(jnp.einsum('hg,rhab->rhagb', eyeH, rmsg).reshape(R, out_dim, out_dim),
                  out_p, out_p)
    bda_cat = jnp.transpose(bd_att, (1, 0, 2)).reshape(out_p, R * out_p).astype(cd)
    bdm_cat = jnp.transpose(bd_msg, (1, 0, 2)).reshape(out_p, R * out_p).astype(cd)

    et_col = jnp.asarray(et_s, jnp.int32).reshape(E_pad, 1)           # int32 column (no one-hot)
    dst_row = jnp.asarray(dst_s, jnp.int32).reshape(1, E_pad)

    itemsize = jnp.dtype(cd).itemsize

    # ---------------------- stage 1: grouped fused K|V|Q projection -----------------------------
    proj_cost = pl.CostEstimate(
        flops=int(2 * Ng_pad * in_p * 3 * out_p),
        transcendentals=0,
        bytes_accessed=int((Ng_pad * in_p + T * in_p * 3 * out_p + Ng_pad * 3 * out_p) * itemsize))
    proj = functools.partial(_proj_kernel, out_p=out_p)
    KV_g, Q_g = pl.pallas_call(
        proj,
        grid_spec=pltpu.PrefetchScalarGridSpec(
            num_scalar_prefetch=1,
            grid=(B,),
            in_specs=[
                pl.BlockSpec((block_n, in_p), lambda i, g: (i, 0)),
                pl.BlockSpec((None, in_p, 3 * out_p), lambda i, g: (g[i], 0, 0)),
            ],
            out_specs=[pl.BlockSpec((block_n, 2 * out_p), lambda i, g: (i, 0)),
                       pl.BlockSpec((block_n, out_p), lambda i, g: (i, 0))],
        ),
        out_shape=[jax.ShapeDtypeStruct((Ng_pad, 2 * out_p), cd),
                   jax.ShapeDtypeStruct((Ng_pad, out_p), cd)],
        compiler_params=pltpu.CompilerParams(dimension_semantics=("parallel",),
                                             vmem_limit_bytes=48 * 1024 * 1024),
        cost_estimate=proj_cost,
    )(gid_d, h_g, w_kvq)

    # Single gather of the K|V slab onto the dst-sorted edge list (half the old gather traffic).
    # TODO(synk): fully fused version would DMA-gather these rows inside the aggregation kernel.
    KVs = KV_g[jnp.asarray(src_s, jnp.int32)]                          # [E_pad, 2*out_p]

    # ------------- stage 2+3 fused: edge messages + online segment softmax + update -------------
    W_total = NSHARD * w_shard
    agg_cost = pl.CostEstimate(
        flops=int(W_total * (4 * block_e * out_p * R * out_p + 4 * H * block_n * block_e * out_p)
                  + B * 2 * block_n * out_p * out_p),
        transcendentals=int(W_total * H * block_n * block_e),
        bytes_accessed=int(W_total * (block_e * (2 * out_p * itemsize + 8)
                                      + 3 * block_n * out_p * itemsize)))

    def _kv_map(s, w, blk, chk, fi, la, grp):
        return (chk[s * w_shard + w], 0)

    def _et_map(s, w, blk, chk, fi, la, grp):
        return (chk[s * w_shard + w], 0)

    def _dst_map(s, w, blk, chk, fi, la, grp):
        return (0, chk[s * w_shard + w])

    def _q_map(s, w, blk, chk, fi, la, grp):
        return (blk[s * w_shard + w], 0)

    def _aw_map(s, w, blk, chk, fi, la, grp):
        return (grp[s * w_shard + w], 0, 0)

    def _bd_map(s, w, blk, chk, fi, la, grp):
        return (0, 0)

    agg = functools.partial(_agg_kernel, num_heads=H, d_k=d_k, num_rels=R,
                            block_n=block_n, out_p=out_p, w_shard=w_shard)
    out_g = pl.pallas_call(
        agg,
        grid_spec=pltpu.PrefetchScalarGridSpec(
            num_scalar_prefetch=5,
            grid=(NSHARD, w_shard),
            in_specs=[
                pl.BlockSpec((block_e, 2 * out_p), _kv_map),          # K|V of this edge chunk
                pl.BlockSpec((block_e, 1), _et_map),                  # int32 relation ids
                pl.BlockSpec((1, block_e), _dst_map),                 # grouped destination ids
                pl.BlockSpec((block_n, out_p), _q_map),               # Q of this node block
                pl.BlockSpec((None, out_p, out_p), _aw_map),          # a_weight (skip folded in)
                pl.BlockSpec((out_p, R * out_p), _bd_map),            # concat relation_att
                pl.BlockSpec((out_p, R * out_p), _bd_map),            # concat relation_msg
            ],
            out_specs=pl.BlockSpec((block_n, out_p), _q_map),
            scratch_shapes=[pltpu.VMEM((block_n, out_p), f32),        # running max (lane-expanded)
                            pltpu.VMEM((block_n, out_p), f32),        # running denominator
                            pltpu.VMEM((block_n, out_p), f32)],       # running weighted-value sum
        ),
        out_shape=jax.ShapeDtypeStruct((Ng_pad, out_p), cd),
        compiler_params=pltpu.CompilerParams(dimension_semantics=("parallel", "arbitrary"),
                                             vmem_limit_bytes=48 * 1024 * 1024),
        cost_estimate=agg_cost,
    )(wblk_d, wchunk_d, wfirst_d, wlast_d, wgrp_d,
      KVs, et_col, dst_row, Q_g, aw_p, bda_cat, bdm_cat)

    # Un-group rows back to original node order, drop feature padding, return in input dtype.
    pos_d = jnp.asarray(pos[:N], jnp.int32)
    return out_g[pos_d, :out_dim].astype(h.dtype)


# ----------------------------------- Pure-JAX reference -----------------------------------------
def hgt_reference(h, ntype, src, dst, etype, params, *, num_heads):
    kw, qw, vw, aw, pri, ratt, rmsg, skip = params
    N = h.shape[0]
    out_dim = kw.shape[-1]
    H = num_heads
    dk = out_dim // H
    sqrt_dk = math.sqrt(out_dim)
    K = jnp.einsum('ni,nio->no', h, kw[ntype]).reshape(N, H, dk)
    Q = jnp.einsum('ni,nio->no', h, qw[ntype]).reshape(N, H, dk)
    V = jnp.einsum('ni,nio->no', h, vw[ntype]).reshape(N, H, dk)
    Kp = jnp.einsum('ehd,ehdf->ehf', K[src], ratt[etype])
    Vp = jnp.einsum('ehd,ehdf->ehf', V[src], rmsg[etype])
    attn = jnp.sum(Kp * Q[dst], axis=-1) * pri[etype] / sqrt_dk           # [E, H]
    mask = (dst[None, :] == jnp.arange(N)[:, None])                       # [N, E]
    logits = jnp.where(mask[:, :, None], attn[None, :, :], -jnp.inf)
    p = jax.nn.softmax(logits, axis=1)
    p = jnp.where(mask[:, :, None], p, 0.0)
    t = jnp.einsum('neh,ehd->nhd', p, Vp).reshape(N, out_dim)
    trans = jnp.einsum('no,nop->np', t, aw[ntype])
    alpha = jax.nn.sigmoid(skip[ntype])                                   # [N, H]
    return (trans.reshape(N, H, dk) * alpha[:, :, None]).reshape(N, out_dim)


def _make_inputs(key, N, E, in_dim, out_dim, num_ntypes, num_rels, num_heads):
    d_k = out_dim // num_heads
    keys = jax.random.split(key, 10)
    h = jax.random.uniform(keys[0], (N, in_dim), jnp.float32)
    ntype = jax.random.randint(keys[1], (N,), 0, num_ntypes)
    src = jax.random.randint(keys[2], (E,), 0, N)
    # first N edges guarantee every node has at least one incoming edge (reference gives NaN
    # for zero in-degree nodes; the kernel gives zeros there -- documented divergence)
    dst = jnp.concatenate([jnp.arange(N, dtype=jnp.int32),
                           jax.random.randint(keys[3], (E - N,), 0, N, dtype=jnp.int32)])
    etype = jax.random.randint(keys[4], (E,), 0, num_rels)
    kw = jax.random.uniform(keys[5], (num_ntypes, in_dim, out_dim), jnp.float32)
    qw = jax.random.uniform(keys[6], (num_ntypes, in_dim, out_dim), jnp.float32)
    vw = jax.random.uniform(keys[7], (num_ntypes, in_dim, out_dim), jnp.float32)
    aw = jax.random.uniform(keys[8], (num_ntypes, out_dim, out_dim), jnp.float32)
    pri = jnp.ones((num_rels, num_heads), jnp.float32)
    ratt = jax.random.uniform(keys[9], (num_rels, num_heads, d_k, d_k), jnp.float32)
    rmsg = jax.random.uniform(jax.random.PRNGKey(1), (num_rels, num_heads, d_k, d_k), jnp.float32)
    skip = jnp.ones((num_ntypes, num_heads), jnp.float32)
    return h, ntype, src, dst, etype, (kw, qw, vw, aw, pri, ratt, rmsg, skip)


if __name__ == "__main__":
    # --- test 1: toy sizes matching the module spec (single edge chunk), strict f32 check -------
    h, ntype, src, dst, etype, params = _make_inputs(
        jax.random.PRNGKey(0), N=8, E=16, in_dim=16, out_dim=16,
        num_ntypes=3, num_rels=2, num_heads=4)
    out = multihead_hgt_forward(h, ntype, src, dst, etype, params, num_heads=4,
                                compute_dtype=jnp.float32)
    out = jax.block_until_ready(out)
    ref = hgt_reference(h, ntype, src, dst, etype, params, num_heads=4)
    np.testing.assert_allclose(np.asarray(out), np.asarray(ref), rtol=2e-3, atol=2e-3)

    # --- test 2: larger graph exercising multi-block / multi-chunk / megacore-shard paths -------
    h2, nt2, s2, d2, et2, p2 = _make_inputs(
        jax.random.PRNGKey(0), N=56, E=256, in_dim=24, out_dim=32,
        num_ntypes=3, num_rels=5, num_heads=4)
    out2 = multihead_hgt_forward(h2, nt2, s2, d2, et2, p2, num_heads=4,
                                 block_n=16, block_e=128, compute_dtype=jnp.float32)
    out2 = jax.block_until_ready(out2)
    ref2 = hgt_reference(h2, nt2, s2, d2, et2, p2, num_heads=4)
    np.testing.assert_allclose(np.asarray(out2), np.asarray(ref2), rtol=2e-3, atol=2e-3)

    # --- default bf16 MXU path (v5e/v6e/v7x lever): smoke run, accumulation/softmax stay f32 ----
    out_bf16 = multihead_hgt_forward(h2, nt2, s2, d2, et2, p2, num_heads=4,
                                     block_n=16, block_e=128)
    out_bf16 = jax.block_until_ready(out_bf16)
    assert np.all(np.isfinite(np.asarray(out_bf16, dtype=np.float32)))

    print("KERNEL_OK")
</pallas_src>

<mosaic_0001>
module attributes {stable_mosaic.version = 11 : i64} {
  func.func @_proj_kernel(%arg0: i32, %arg1: memref<3xi32, #tpu.memory_space<smem>>, %arg2: memref<8x128xf32, #tpu.memory_space<vmem>>, %arg3: memref<1x128x384xf32, #tpu.memory_space<vmem>>, %arg4: memref<8x256xf32, #tpu.memory_space<vmem>>, %arg5: memref<8x128xf32, #tpu.memory_space<vmem>>) attributes {dimension_semantics = [#tpu.dimension_semantics<parallel>], iteration_bounds = array<i64: 3>, scalar_prefetch = 1 : i64, scratch_operands = 0 : i64, tpu.core_type = #tpu.core_type<tc>, window_params = [{transform_indices = @transform_0, window_bounds = array<i64: 8, 128>}, {transform_indices = @transform_1, window_bounds = array<i64: 1, 128, 384>}, {transform_indices = @transform_2, window_bounds = array<i64: 8, 256>}, {transform_indices = @transform_3, window_bounds = array<i64: 8, 128>}]} {
    %c0 = arith.constant 0 : index
    %c0_0 = arith.constant 0 : index
    %0 = vector.load %arg2[%c0, %c0_0] : memref<8x128xf32, #tpu.memory_space<vmem>>, vector<8x128xf32>
    %c0_1 = arith.constant 0 : index
    %c0_2 = arith.constant 0 : index
    %c0_3 = arith.constant 0 : index
    %1 = vector.load %arg3[%c0_1, %c0_2, %c0_3] : memref<1x128x384xf32, #tpu.memory_space<vmem>>, vector<1x128x384xf32>
    %2 = vector.shape_cast %1 : vector<1x128x384xf32> to vector<128x384xf32>
    %cst = arith.constant dense<0.000000e+00> : vector<8x384xf32>
    %3 = tpu.matmul %0, %2, %cst {dimension_numbers = #tpu.dot_dimension_numbers<[1], [0], [0], [1], [0, 0, 1, 1], [], []>} : vector<8x128xf32>, vector<128x384xf32>, vector<8x384xf32> -> vector<8x384xf32>
    %4 = vector.extract_strided_slice %3 {offsets = [0, 0], sizes = [8, 256], strides = [1, 1]} : vector<8x384xf32> to vector<8x256xf32>
    %c0_4 = arith.constant 0 : index
    %c0_5 = arith.constant 0 : index
    %5 = vector.load %arg4[%c0_4, %c0_5] : memref<8x256xf32, #tpu.memory_space<vmem>>, vector<8x256xf32>
    tpu.vector_store %arg4[%c0_4, %c0_5], %4 {strides = array<i32>} : memref<8x256xf32, #tpu.memory_space<vmem>>, vector<8x256xf32>,
    %6 = vector.extract_strided_slice %3 {offsets = [0, 256], sizes = [8, 128], strides = [1, 1]} : vector<8x384xf32> to vector<8x128xf32>
    %c0_6 = arith.constant 0 : index
    %c0_7 = arith.constant 0 : index
    %7 = vector.load %arg5[%c0_6, %c0_7] : memref<8x128xf32, #tpu.memory_space<vmem>>, vector<8x128xf32>
    tpu.vector_store %arg5[%c0_6, %c0_7], %6 {strides = array<i32>} : memref<8x128xf32, #tpu.memory_space<vmem>>, vector<8x128xf32>,
    return
  }
  func.func @transform_0(%arg0: i32, %arg1: memref<3xi32, #tpu.memory_space<smem>>) -> (i32, i32) {
    %c0_i32 = arith.constant 0 : i32
    %c0_i32_0 = arith.constant 0 : i32
    return %arg0, %c0_i32 : i32, i32
  }
  func.func @transform_1(%arg0: i32, %arg1: memref<3xi32, #tpu.memory_space<smem>>) -> (i32, i32, i32) {
    %0 = arith.index_cast %arg0 : i32 to index
    %1 = memref.load %arg1[%0] : memref<3xi32, #tpu.memory_space<smem>>
    %c0_i32 = arith.constant 0 : i32
    %c0_i32_0 = arith.constant 0 : i32
    %c0_i32_1 = arith.constant 0 : i32
    return %1, %c0_i32, %c0_i32_0 : i32, i32, i32
  }
  func.func @transform_2(%arg0: i32, %arg1: memref<3xi32, #tpu.memory_space<smem>>) -> (i32, i32) {
    %c0_i32 = arith.constant 0 : i32
    %c0_i32_0 = arith.constant 0 : i32
    return %arg0, %c0_i32 : i32, i32
  }
  func.func @transform_3(%arg0: i32, %arg1: memref<3xi32, #tpu.memory_space<smem>>) -> (i32, i32) {
    %c0_i32 = arith.constant 0 : i32
    %c0_i32_0 = arith.constant 0 : i32
    return %arg0, %c0_i32 : i32, i32
  }
}

</mosaic_0001>

<bundles_post_ra>
// kernel: tpu_custom_call.1
= control target key start
LH: loop header
LB: loop body
LE: loop exit
PB: predicated region body
PF: predicated region fallthrough
CT: control target
= control target key end

     0   :  { %s838_s18 = smov [#allocation3]   ;;  %s1172_s0 = inlined_call_operand.hbm [shape: s32[3], index: 0, kind: input, shape index: {}]   ;;  %s1173_s1 = inlined_call_operand.hbm [shape: f32[24,128], index: 1, kind: input, shape index: {}]   ;;  %s1174_s2 = inlined_call_operand.hbm [shape: f32[3,128,384], index: 2, kind: input, shape index: {}]   ;;  %s1175_s3 = inlined_call_operand.hbm [shape: f32[24,256], index: 3, kind: output, shape index: {0}]   ;;  %s1176_s4 = inlined_call_operand.hbm [shape: f32[24,128], index: 4, kind: output, shape index: {1}]  }
   0x1   :  { %1181 = sst [smem:[#allocation22_spill]] %s1173_s1  ;;  %s11_s17 = sshll.u32 %s1172_s0, 4  ;;  %s12_s17 = int_to_ptr.hbm [resolvable:$true] %s11_s17 }
   0x2   :  { %14 = dma.hbm_to_smem %s12_s17, 16, %s838_s18, [#allocation2] }
   0x3   :  { %792 = dma.done.wait [#allocation2], 16 }
   0x4   :  { %793 = vsyncadd [#allocation2], 4294967280 }
   0x5   :  { %17 = sfence }
   0x6   :  { %18 = vsyncpa [#allocation5], 0 }
   0x7   :  { %20 = vsyncpa [#allocation5 + $0x1], 0 }
   0x8   :  { %21 = vsyncpa [#allocation8], 0 }
   0x9   :  { %23 = vsyncpa [#allocation8 + $0x1], 0 }
   0xa   :  { %24 = vsyncpa [#allocation6], 0 }
   0xb   :  { %26 = vsyncpa [#allocation6 + $0x1], 0 }
   0xc   :  { %27 = vsyncpa [#allocation11], 0 }
   0xd   :  { %29 = vsyncpa [#allocation11 + $0x1], 0  ;;  %s869_s19 = smov 0   ;;  %s871_s20 = smov 0  }
   0xe   :  { %s873_s21 = smov 0   ;;  %s875_s0 = smov 0  }
   0xf   :  { %s877_s22 = smov 0   ;;  %s879_s23 = smov 0  }
  0x10   :  { %s881_s24 = smov 0  }
  0x11 LB: > { %1182 = sst [smem:[#allocation19_spill]] %s832_s23  ;;  %s903_s25 = sadd.s32 4294967295, %s836_s24   ;;  %s836_s24 = sphi %s881_s24, %s1200_s24   ;;  %s832_s23 = sphi %s879_s23, %s1202_s23   ;;  %s828_s22 = sphi %s877_s22, %s1207_s22   ;;  %s824_s0 = sphi %s875_s0, %s1206_s0   ;;  %s820_s21 = sphi %s873_s21, %s1205_s21   ;;  %s816_s20 = sphi %s871_s20, %s1204_s20   ;;  %s812_s19 = sphi %s869_s19, %s1203_s19  }
  0x12   : > { %s906_s26 = sadd.s32 1, %s836_s24   ;;  %s42_s27 = sadd.s32 1, %s832_s23 }
  0x13   : > { %1183 = sst [smem:[#allocation20_spill]] %s906_s26  ;;  %s39_s28 = ssub.s32 %s836_s24, %s906_s26 }
  0x14   : > { %p49_p0 = scmp.ne.s32.totalorder %s832_s23, %s828_s22  ;;  %p40_p1 = scmp.eq.s32.totalorder %s39_s28, 0 }
  0x15   : > { %p50_p2 = scmp.eq.s32.totalorder %s836_s24, 0  ;;  %p55_p3 = scmp.ne.s32.totalorder %s828_s22, %s824_s0 }
  0x16   : > { %p56_p4 = scmp.eq.s32.totalorder %s903_s25, 0  ;;  %s528_s30 = sadd.s32 4294967294, %s836_s24  }
  0x17   : > { %s918_s29 = scalar_select %p40_p1, %s832_s23, %s42_s27  }
  0x18   : > { %p924_p5 = por %p56_p4, %p55_p3  ;;  %p933_p6 = por %p50_p2, %p49_p0 }
  0x19   : > { %1184 = sst [smem:[#allocation21_spill]] %s918_s29  ;;  %s70_s9 = sadd.s32 1, %s820_s21 }
  0x1a   : > { %s65_s7 = sld [smem:[#allocation3 + %s836_s24]]  ;;  %p83_p7 = scmp.ne.s32.totalorder %s816_s20, %s812_s19 }
  0x1b   : > { %s66_s8 = sld [smem:[#allocation3 + %s906_s26]]  ;;  %p107_p8 = scmp.eq.s32.totalorder %s903_s25, 2 }
  0x1c   : > { %p77_p9 = scmp.ne.s32.totalorder %s820_s21, %s816_s20  ;;  %p113_p10 = scmp.eq.s32.totalorder %s528_s30, 2 }
  0x1d   : > { %p944_p11 = por %p83_p7, %p56_p4  ;;  %p951_p12 = por %p107_p8, %p49_p0 }
  0x1e   : > { %p958_p13 = por %p113_p10, %p55_p3  ;;  %p1179_p1 = scmp.lt.s32.totalorder %s836_s24, 3 }
  0x1f   : > { %s159_s13 = sand.u32 1, %s832_s23   ;;  %s532_s16 = sshll.u32 %s836_s24, 3 }
  0x20   : > { %s531_s15 = sshll.u32 %s159_s13, 3  ;;  %s1190_s1 = sld [smem:[#allocation22_spill]] }
  0x21   : > { %s67_s14 = ssub.s32 %s65_s7, %s66_s8  ;;  %s163_s28 = scalar_lea.vmem [#allocation4], %s531_s15 }
  0x22   : > { %p68_p4 = scmp.eq.s32.totalorder %s67_s14, 0  ;;  %s171_s30 = sshll.u32 %s163_s28, 4  ;;  %s172_s30 = int_to_ptr.vmem [resolvable:$true] %s171_s30 }
  0x23   : > { %p975_p0 = pnand %p1179_p1, %p933_p6  ;;  %p986_p8 = por %p77_p9, %p50_p2 }
  0x24   : > { %s966_s17 = scalar_select %p68_p4, %s820_s21, %s70_s9  }
  0x25   : > { %s160_s8 = scalar_lea.sflag [#allocation5], %s159_s13  ;;  %p652_p4 = pneg %p975_p0 }
  0x26   : > { %s167_s27 = scalar_lea.hbm %s1190_s1, %s532_s16  ;;  %s655_s16 = scalar_lea.hbm %s1190_s1, 24 }
  0x27   : > { %s169_s29 = sshll.u32 %s167_s27, 4  ;;  %s170_s29 = int_to_ptr.hbm [resolvable:$true] %s169_s29 }
  0x28   : > { %s648_s9 = sshra.s32 %s170_s29, 4  ;;  %s649_s9 = int_to_ptr.hbm [resolvable:$true] %s648_s9 }
  0x29   : > { %s650_s14 = scalar_lea.hbm %s649_s9, 8  ;;  %p656_p2 = scmp.lt.s32.totalorder %s649_s9, %s1190_s1 }
  0x2a   : > { %p651_p10 = scmp.ne.s32.totalorder %s649_s9, %s650_s14  ;;  %p657_p9 = scmp.lt.s32.totalorder %s655_s16, %s650_s14 }
  0x2c   : > { %p653_p6 = pnand %p652_p4, %p651_p10  ;;  %p658_p3 = por %p657_p9, %p656_p2 }
  0x2e   : > { %p654_p1 = pneg %p653_p6 }
  0x30   : > { %p659_p7 = pnand %p658_p3, %p654_p1 }
  0x32   : > { %662 = shalt.err (!%p659_p7)
}
  0x33   : > { %562 = dma.hbm_to_vmem [thread:$0]  (!%p975_p0), %s170_s29, 128, %s172_s30, %s160_s8  }
  0x34   : > { %p1193_p10 = scmp.lt.s32.totalorder %s836_s24, 4  ;;  %p1194_p4 = scmp.ge.s32.totalorder %s836_s24, 1 }
  0x35   : > { %s178_s27 = sand.u32 1, %s820_s21   ;;  %p1196_p1 = scmp.lt.s32.totalorder %s836_s24, 3 }
  0x36   : > { %p1004_p6 = pnand %p1194_p4, %p1193_p10  ;;  %s546_s9 = smul.u32 384, %s178_s27 }
  0x37   : > { %p1013_p3 = pnand %p1196_p1, %p986_p8  ;;  %p1198_p7 = pmov %p1196_p1 }
  0x38   : > { %s550_s28 = scalar_select %p986_p8, [#allocation3], [#allocation12] }
  0x39   : > { %s551_s14 = scalar_select %p986_p8, %s836_s24, 0 }
  0x3a   : > { %s1209_s28 = smov (!%p1198_p7, %s550_s28), [#allocation13]  ;;  %p1199_p0 = pmov %p1196_p1 }
  0x3b   : > { %s182_s30 = scalar_lea.vmem [#allocation7], %s546_s9  ;;  %s179_s1 = scalar_lea.sflag [#allocation8], %s178_s27 }
  0x3c   : > { %s1211_s14 = smov (!%p1199_p0, %s551_s14), 0  ;;  %s191_s8 = sshll.u32 %s182_s30, 4  ;;  %s192_s8 = int_to_ptr.vmem [resolvable:$true] %s191_s8 }
  0x3d   : > { %s183_s29 = sld [smem:[%s1209_s28 + %s1211_s14]]  ;;  %p682_p2 = pneg %p1013_p3 }
  0x3e   : > { %s685_s14 = scalar_lea.hbm %s1174_s2, 1152 }
  0x43   : > { %s547_s6 = smul.u32 384, %s183_s29 }
  0x45   : > { %s188_s18 = scalar_lea.hbm %s1174_s2, %s547_s6 }
  0x46   : > { %s189_s19 = sshll.u32 %s188_s18, 4  ;;  %s190_s19 = int_to_ptr.hbm [resolvable:$true] %s189_s19 }
  0x47   : > { %s678_s23 = sshra.s32 %s190_s19, 4  ;;  %s679_s23 = int_to_ptr.hbm [resolvable:$true] %s678_s23 }
  0x48   : > { %s680_s7 = scalar_lea.hbm %s679_s23, 384  ;;  %p686_p4 = scmp.lt.s32.totalorder %s679_s23, %s1174_s2 }
  0x49   : > { %p681_p8 = scmp.ne.s32.totalorder %s679_s23, %s680_s7  ;;  %p687_p1 = scmp.lt.s32.totalorder %s685_s14, %s680_s7 }
  0x4b   : > { %p683_p9 = pnand %p682_p2, %p681_p8  ;;  %p688_p7 = por %p687_p1, %p686_p4 }
  0x4d   : > { %p684_p10 = pneg %p683_p9 }
  0x4f   : > { %p689_p0 = pnand %p688_p7, %p684_p10 }
  0x51   : > { %692 = shalt.err (!%p689_p0)
}
  0x52   : > { %s839_s27 = smov 384   ;;  %s840_s6 = smov 24  }
  0x53   : > { %567 = dma.hbm_to_vmem [thread:$0]  (!%p1013_p3), %s190_s19, 6144, %s192_s8, %s179_s1, %s839_s27, %s839_s27, %s840_s6  }
  0x54   : > { %203 = sbr.rel (%p1004_p6) target bundleno = 270 (0x10e), region = 28  ;;  %s1042_s15 = sand.u32 (!%p1004_p6), 1, %s828_s22  }
  0x55   : > { %s535_s23 = sshll.u32 (!%p1004_p6), %s1042_s15, 3  ;;  %s206_s16 = scalar_lea.sflag (!%p1004_p6), [#allocation5], %s1042_s15 }
  0x56   : > { %s1048_s18 = scalar_lea.vmem (!%p1004_p6), [#allocation4], %s535_s23 }
  0x59   : > { %795 = dma.done.wait (%p924_p5), %s206_s16, 128  }
  0x5a   : > { %797 = vsyncadd (%p924_p5), %s206_s16, 4294967168  ;;  %s215_s1 = sand.u32 1, %s816_s20  }
  0x5b   : > { %s548_s13 = smul.u32 384, %s215_s1  ;;  %s216_s26 = scalar_lea.sflag [#allocation8], %s215_s1 }
  0x5d   : > { %s1055_s8 = scalar_lea.vmem [#allocation7], %s548_s13 }
  0x5e   : > { %799 = dma.done.wait (%p944_p11), %s216_s26, 6144  }
  0x5f   : > { %801 = vsyncadd (%p944_p11), %s216_s26, 4294961152  ;;  %v302_v0 = vld [vmem:[%s1055_s8 + $0x178] sm:$0xff]  ;;  %v299_v1 = vld [vmem:[%s1055_s8 + $0x160] sm:$0xff]  ;;  %s536_s5 = sshll.u32 %s1042_s15, 4  ;;  %s545_s10 = sshll.u32 %s903_s25, 4 }
  0x60   : > { %343 = vmatpush.msra.mxu2 %v302_v0  ;;  %v300_v2 = vld [vmem:[%s1055_s8 + $0x168] sm:$0xff]  ;;  %v301_v3 = vld [vmem:[%s1055_s8 + $0x170] sm:$0xff]  ;;  %v298_v6 = vld [vmem:[%s1055_s8 + $0x158] sm:$0xff]  ;;  %s383_s28 = scalar_lea.hbm %s1175_s3, %s545_s10  ;;  %s542_s9 = sshll.u32 %s903_s25, 3 }
  0x61   : > { %v296_v4 = vld [vmem:[%s1055_s8 + $0x148] sm:$0xff]  ;;  %303 = vmatpush.msra.mxu0 %v300_v2  ;;  %323 = vmatpush.msra.mxu1 %v301_v3  ;;  %v297_v5 = vld [vmem:[%s1055_s8 + $0x150] sm:$0xff]  ;;  %v294_v7 = vld [vmem:[%s1055_s8 + $0x138] sm:$0xff]  ;;  %s245_s14 = scalar_lea.vmem [#allocation9], %s536_s5  ;;  %s387_s30 = sshll.u32 %s383_s28, 4  ;;  %s388_s30 = int_to_ptr.hbm [resolvable:$true] %s387_s30 }
  0x62   : > { %344 = vmatpush.msra.mxu2 %v299_v1  ;;  %v295_v8 = vld [vmem:[%s1055_s8 + $0x140] sm:$0xff]  ;;  %v293_v9 = vld [vmem:[%s1055_s8 + $0x130] sm:$0xff]  ;;  %v292_v11 = vld [vmem:[%s1055_s8 + $0x128] sm:$0xff]  ;;  %s385_s29 = sshll.u32 %s245_s14, 4  ;;  %s397_s16 = scalar_lea.hbm %s1176_s4, %s542_s9  ;;  %s386_s29 = int_to_ptr.vmem [resolvable:$true] %s385_s29 }
  0x63   : > { %304 = vmatpush.msra.mxu0 %v297_v5  ;;  %324 = vmatpush.msra.mxu1 %v298_v6  ;;  %v291_v10 = vld [vmem:[%s1055_s8 + $0x120] sm:$0xff]  ;;  %v290_v12 = vld [vmem:[%s1055_s8 + $0x118] sm:$0xff]  ;;  %v288_v13 = vld [vmem:[%s1055_s8 + $0x108] sm:$0xff]  ;;  %s401_s13 = sshll.u32 %s397_s16, 4  ;;  %s367_s25 = scalar_lea.sflag [#allocation6], %s1042_s15  ;;  %s402_s13 = int_to_ptr.hbm [resolvable:$true] %s401_s13 }
  0x64   : > { %345 = vmatpush.msra.mxu2 %v296_v4  ;;  %v289_v14 = vld [vmem:[%s1055_s8 + $0x110] sm:$0xff]  ;;  %v287_v15 = vld [vmem:[%s1055_s8 + $0x100] sm:$0xff]  ;;  %v286_v17 = vld [vmem:[%s1055_s8 + $0xf8] sm:$0xff]  ;;  %s722_s26 = sshra.s32 %s388_s30, 4  ;;  %s723_s26 = int_to_ptr.hbm [resolvable:$true] %s722_s26 }
  0x65   : > { %305 = vmatpush.msra.mxu0 %v294_v7  ;;  %325 = vmatpush.msra.mxu1 %v295_v8  ;;  %v285_v16 = vld [vmem:[%s1055_s8 + $0xf0] sm:$0xff]  ;;  %v284_v18 = vld [vmem:[%s1055_s8 + $0xe8] sm:$0xff]  ;;  %v282_v19 = vld [vmem:[%s1055_s8 + $0xd8] sm:$0xff]  ;;  %p729_p3 = scmp.lt.s32.totalorder %s723_s26, %s1175_s3 }
  0x66   : > { %346 = vmatpush.msra.mxu2 %v293_v9  ;;  %v283_v20 = vld [vmem:[%s1055_s8 + $0xe0] sm:$0xff]  ;;  %v281_v21 = vld [vmem:[%s1055_s8 + $0xd0] sm:$0xff]  ;;  %v280_v23 = vld [vmem:[%s1055_s8 + $0xc8] sm:$0xff] }
  0x67   : > { %306 = vmatpush.msra.mxu0 %v291_v10  ;;  %326 = vmatpush.msra.mxu1 %v292_v11  ;;  %v279_v22 = vld [vmem:[%s1055_s8 + $0xc0] sm:$0xff]  ;;  %v278_v24 = vld [vmem:[%s1055_s8 + $0xb8] sm:$0xff]  ;;  %v276_v25 = vld [vmem:[%s1055_s8 + $0xa8] sm:$0xff] }
  0x68   : > { %347 = vmatpush.msra.mxu2 %v290_v12  ;;  %v277_v26 = vld [vmem:[%s1055_s8 + $0xb0] sm:$0xff]  ;;  %v275_v27 = vld [vmem:[%s1055_s8 + $0xa0] sm:$0xff]  ;;  %v274_v29 = vld [vmem:[%s1055_s8 + $0x98] sm:$0xff] }
  0x69   : > { %307 = vmatpush.msra.mxu0 %v288_v13  ;;  %327 = vmatpush.msra.mxu1 %v289_v14  ;;  %v273_v28 = vld [vmem:[%s1055_s8 + $0x90] sm:$0xff]  ;;  %v272_v30 = vld [vmem:[%s1055_s8 + $0x88] sm:$0xff]  ;;  %v270_v31 = vld [vmem:[%s1055_s8 + $0x78] sm:$0xff] }
  0x6a   : > { %348 = vmatpush.msra.mxu2 %v287_v15  ;;  %v271_v32 = vld [vmem:[%s1055_s8 + $0x80] sm:$0xff]  ;;  %v269_v33 = vld [vmem:[%s1055_s8 + $0x70] sm:$0xff]  ;;  %v268_v35 = vld [vmem:[%s1055_s8 + $0x68] sm:$0xff] }
  0x6b   : > { %308 = vmatpush.msra.mxu0 %v285_v16  ;;  %328 = vmatpush.msra.mxu1 %v286_v17  ;;  %v267_v34 = vld [vmem:[%s1055_s8 + $0x60] sm:$0xff]  ;;  %v266_v36 = vld [vmem:[%s1055_s8 + $0x58] sm:$0xff]  ;;  %v264_v37 = vld [vmem:[%s1055_s8 + $0x48] sm:$0xff] }
  0x6c   : > { %349 = vmatpush.msra.mxu2 %v284_v18  ;;  %v265_v38 = vld [vmem:[%s1055_s8 + $0x50] sm:$0xff]  ;;  %v263_v39 = vld [vmem:[%s1055_s8 + $0x40] sm:$0xff]  ;;  %v262_v41 = vld [vmem:[%s1055_s8 + $0x38] sm:$0xff] }
  0x6d   : > { %309 = vmatpush.msra.mxu0 %v282_v19  ;;  %329 = vmatpush.msra.mxu1 %v283_v20  ;;  %v261_v40 = vld [vmem:[%s1055_s8 + $0x30] sm:$0xff]  ;;  %v260_v42 = vld [vmem:[%s1055_s8 + $0x28] sm:$0xff]  ;;  %v258_v43 = vld [vmem:[%s1055_s8 + $0x18] sm:$0xff] }
  0x6e   : > { %350 = vmatpush.msra.mxu2 %v281_v21  ;;  %v259_v44 = vld [vmem:[%s1055_s8 + $0x20] sm:$0xff]  ;;  %v257_v45 = vld [vmem:[%s1055_s8 + $0x10] sm:$0xff]  ;;  %v256_v48 = vld [vmem:[%s1055_s8 + $0x8] sm:$0xff] }
  0x6f   : > { %310 = vmatpush.msra.mxu0 %v279_v22  ;;  %330 = vmatpush.msra.mxu1 %v280_v23  ;;  %v254_v46 = vld [vmem:[%s1048_s18] sm:$0xff]  ;;  %v255_v47 = vld [vmem:[%s1055_s8] sm:$0xff]  ;;  %s252_s18 = scalar_lea.vmem [#allocation10], %s535_s23  ;;  %s724_s8 = scalar_lea.hbm %s723_s26, 16 }
  0x70   : > { %351 = vmatpush.msra.mxu2 %v278_v24  ;;  %s399_s1 = sshll.u32 %s252_s18, 4  ;;  %p725_p5 = scmp.ne.s32.totalorder %s723_s26, %s724_s8  ;;  %s1121_s1 = int_to_ptr.vmem [resolvable:$true] %s399_s1 }
  0x71   : > { %311 = vmatpush.msra.mxu0 %v276_v25  ;;  %331 = vmatpush.msra.mxu1 %v277_v26  ;;  %s728_s23 = scalar_lea.hbm %s1175_s3, 48 }
  0x72   : > { %352 = vmatpush.msra.mxu2 %v275_v27  ;;  %p726_p11 = pnand %p725_p5, %p951_p12  ;;  %p730_p8 = scmp.lt.s32.totalorder %s728_s23, %s724_s8 }
  0x73   : > { %312 = vmatpush.msra.mxu0 %v273_v28  ;;  %332 = vmatpush.msra.mxu1 %v274_v29 }
  0x74   : > { %353 = vmatpush.msra.mxu2 %v272_v30  ;;  %p727_p6 = pneg %p726_p11  ;;  %p731_p2 = por %p730_p8, %p729_p3 }
  0x75   : > { %313 = vmatpush.msra.mxu0 %v270_v31  ;;  %333 = vmatpush.msra.mxu1 %v271_v32 }
  0x76   : > { %354 = vmatpush.msra.mxu2 %v269_v33  ;;  %p732_p9 = pnand %p731_p2, %p727_p6 }
  0x77   : > { %314 = vmatpush.msra.mxu0 %v267_v34  ;;  %334 = vmatpush.msra.mxu1 %v268_v35 }
  0x78   : > { %355 = vmatpush.msra.mxu2 %v266_v36 }
  0x79   : > { %315 = vmatpush.msra.mxu0 %v264_v37  ;;  %335 = vmatpush.msra.mxu1 %v265_v38 }
  0x7a   : > { %356 = vmatpush.msra.mxu2 %v263_v39 }
  0x7b   : > { %316 = vmatpush.msra.mxu0 %v261_v40  ;;  %336 = vmatpush.msra.mxu1 %v262_v41 }
  0x7c   : > { %357 = vmatpush.msra.mxu2 %v260_v42 }
  0x7d   : > { %317 = vmatpush.msra.mxu0 %v258_v43  ;;  %337 = vmatpush.msra.mxu1 %v259_v44 }
  0x7e   : > { %358 = vmatpush.msra.mxu2 %v257_v45 }
  0x7f   : > { %359 = vmatmul.f32.vlgmr.msra.gmra.mxu2 %v254_v46  ;;  %318 = vmatpush.msra.mxu0 %v255_v47 }
  0x80   : > { %338 = vmatpush.msra.mxu1 %v256_v48  ;;  %319 = vmatmul.f32.vlgmr.msra.gmra.mxu0 %v254_v46 }
  0x81   : > { %339 = vmatmul.f32.vlgmr.msra.gmra.mxu1 %v254_v46 }
  0xfd   : > { %v320_v49 = vpop.f32.mrf.mxu0 }
  0xfe   : > { %363 = vst [vmem:[%s245_s14] sm:$0xff] %v320_v49  ;;  %v340_v50 = vpop.f32.mrf.mxu1 }
  0xff   : > { %364 = vst [vmem:[%s245_s14 + $0x8] sm:$0xff] %v340_v50 }
 0x100   : > { %735 = shalt.err (!%p732_p9)
}
 0x101   : > { %555 = dma.vmem_to_hbm [thread:$0]  (%p951_p12), %s386_s29, 256, %s388_s30, %s367_s25  }
 0x102   : > { %v360_v51 = vpop.f32.mrf.mxu2  ;;  %s372_s28 = scalar_lea.sflag [#allocation11], %s1042_s15  ;;  %s750_s9 = sshra.s32 %s402_s13, 4  ;;  %s751_s9 = int_to_ptr.hbm [resolvable:$true] %s750_s9 }
 0x103   : > { %365 = vst [vmem:[%s252_s18] sm:$0xff] %v360_v51  ;;  %s752_s14 = scalar_lea.hbm %s751_s9, 8  ;;  %s756_s16 = scalar_lea.hbm %s1176_s4, 24 }
 0x104   : > { %p753_p10 = scmp.ne.s32.totalorder %s751_s9, %s752_s14  ;;  %p757_p7 = scmp.lt.s32.totalorder %s751_s9, %s1176_s4 }
 0x105   : > { %p758_p0 = scmp.lt.s32.totalorder %s756_s16, %s752_s14 }
 0x106   : > { %p754_p4 = pnand %p753_p10, %p951_p12 }
 0x107   : > { %p759_p5 = por %p758_p0, %p757_p7 }
 0x108   : > { %p755_p1 = pneg %p754_p4 }
 0x10a   : > { %p760_p11 = pnand %p759_p5, %p755_p1 }
 0x10c   : > { %763 = shalt.err (!%p760_p11)
}
 0x10d   : > { %556 = dma.vmem_to_hbm [thread:$0]  (%p951_p12), %s1121_s1, 128, %s402_s13, %s372_s28  }
 0x10e PF: > { %p576_p6 = scmp.ge.s32.totalorder %s836_s24, 2  ;;  %s413_s15 = sand.u32 1, %s824_s0  }
 0x10f   : > { %s414_s29 = scalar_lea.sflag [#allocation6], %s413_s15 }
 0x110   : > { %p569_p3 = pnand %p576_p6, %p958_p13 }
 0x112   : > { %p570_p8 = pneg %p569_p3 }
 0x114   : > { %803 = dma.done.wait (%p570_p8), %s414_s29, 256  }
 0x115   : > { %805 = vsyncadd (%p570_p8), %s414_s29, 4294967040  ;;  %s424_s30 = scalar_lea.sflag [#allocation11], %s413_s15 }
 0x116   : > { %807 = dma.done.wait (%p570_p8), %s424_s30, 128  }
 0x117   : > { %809 = vsyncadd (%p570_p8), %s424_s30, 4294967168  ;;  %s1200_s24 = sld [smem:[#allocation20_spill]]  ;;  %s1203_s19 = smov %s816_s20 }
 0x118   : > { %s1201_s11 = sld [smem:[#allocation19_spill]]  ;;  %s1204_s20 = smov %s820_s21 }
 0x119   : > { %s1202_s23 = sld [smem:[#allocation21_spill]]  ;;  %s1205_s21 = smov %s966_s17 }
 0x11a   : > { %s1206_s0 = smov %s828_s22 }
 0x11d   : > { %p32_p12 = scmp.ge.s32.totalorder %s1200_s24, 5  }
 0x11e   : > { %s1207_s22 = smov %s1201_s11 }
 0x11f   :  { %34 = sbr.rel (!%p32_p12) target bundleno = 17 (0x11), region = 103 }
 0x124   :  { %430 = vsyncpa [#allocation5], 1 }
 0x125   :  { %432 = vsyncpa [#allocation5 + $0x1], 1 }
 0x126   :  { %433 = vsyncpa [#allocation8], 1 }
 0x127   :  { %435 = vsyncpa [#allocation8 + $0x1], 1 }
 0x128   :  { %436 = vsyncpa [#allocation6], 1 }
 0x129   :  { %438 = vsyncpa [#allocation6 + $0x1], 1 }
 0x12a   :  { %439 = vsyncpa [#allocation11], 1 }
 0x12b   :  { %441 = vsyncpa [#allocation11 + $0x1], 1 }

</bundles_post_ra>
